<compile_context>
chip_gen: v6e
topology: v6e:2x2x1
jax: 0.10.0
libtpu: 0.0.40
codegen_flags: <defaults>
</compile_context>

<pallas_src>
import functools

import jax
import jax.numpy as jnp
from jax.experimental import pallas as pl
from jax.experimental.pallas import tpu as pltpu


def _round_up(x, m):
    return ((x + m - 1) // m) * m


def _vmem_capacity_bytes():
    """Per-TensorCore VMEM capacity (generation-aware) with a conservative fallback."""
    try:
        cap = int(getattr(pltpu.get_tpu_info(), "vmem_capacity_bytes", 0))
        if cap > 0:
            return cap
    except Exception:
        pass
    return 64 * 1024 * 1024  # conservative: v7x has 64 MiB per TensorCore


# ---------------------------------------------------------------------------
# Path 1: word table resident in VMEM; gather via one-hot matmul on the MXU.
# ---------------------------------------------------------------------------
def _resident_kernel(ids_ref, word_ref, pos_ref, out_ref):
    # ids_ref : (1, ts, 1) int32   VMEM block (token ids for this tile)
    # word_ref: (vocab, d)         VMEM resident (copied from HBM once)
    # pos_ref : (ts, d)            VMEM block (positional rows for this tile)
    # out_ref : (1, ts, d)         VMEM block (dense writeback)
    idx = ids_ref[0]                                    # (ts, 1)
    ts = idx.shape[0]
    vocab = word_ref.shape[0]
    # One-hot gather on the (otherwise idle) MXU. Out-of-range ids produce a
    # zero row (PyTorch would raise; a TPU kernel cannot raise).
    # TODO(synk): benchmark a jnp.take-based dynamic_gather against this path.
    onehot = (idx == jax.lax.broadcasted_iota(jnp.int32, (ts, vocab), 1))
    onehot = onehot.astype(word_ref.dtype)
    emb = jnp.dot(onehot, word_ref[...],
                  preferred_element_type=jnp.float32,
                  precision=jax.lax.Precision.HIGHEST)   # (ts, d) f32
    out_ref[0] = (emb + pos_ref[...].astype(jnp.float32)).astype(out_ref.dtype)


# ---------------------------------------------------------------------------
# Path 2: large vocab -- word table stays in HBM, sliding-window manual DMA gather.
# ---------------------------------------------------------------------------
def _hbm_gather_kernel(ids_smem, word_hbm, pos_ref, out_ref, stage, sems, *, seq):
    # ids_smem: (batch*seq,) int32 in SMEM (scalar prefetch; drives DMA addresses)
    # word_hbm: (vocab, d) ref left in HBM (memory_space=pl.ANY)
    # pos_ref : (ts, d) VMEM block, stage: (ts, d) VMEM scratch, sems: DMA sems.
    s_blk = pl.program_id(0)
    b = pl.program_id(1)
    ts = stage.shape[0]
    vocab = word_hbm.shape[0]
    window = sems.shape[0]

    def row_copy(r):
        s = jnp.minimum(s_blk * ts + r, seq - 1)           # clamp partial last tile
        tok = jnp.clip(ids_smem[b * seq + s], 0, vocab - 1)
        return pltpu.make_async_copy(word_hbm.at[tok], stage.at[r],
                                     sems.at[r % window])

    for r in range(min(window, ts)):                       # prime the DMA window
        row_copy(r).start()

    def body(r, carry):
        row_copy(r).wait()

        @pl.when(r + window < ts)
        def _():
            row_copy(r + window).start()

        return carry

    jax.lax.fori_loop(0, ts, body, 0)

    out_ref[0] = (stage[...].astype(jnp.float32)
                  + pos_ref[...].astype(jnp.float32)).astype(out_ref.dtype)


# ---------------------------------------------------------------------------
# Wrapper
# ---------------------------------------------------------------------------
def full_embedding(ids, word_weight, pos_weight, *, seq_tile=None, force_path=None):
    """ids: (batch, seq) int tokens; word_weight: (vocab, d); pos_weight: (max_len, d).

    Returns (batch, seq, d) = word_weight[ids] + pos_weight[:seq] (broadcast over batch).
    """
    batch, seq = ids.shape
    vocab, d_model = word_weight.shape
    max_len = pos_weight.shape[0]
    assert seq <= max_len, "sequence length exceeds positional-embedding table"
    assert pos_weight.shape[1] == d_model

    itemsize = word_weight.dtype.itemsize
    n_rows = batch * seq
    cap = _vmem_capacity_bytes()
    budget = int(0.85 * cap)                 # headroom for double buffers / compiler
    table_bytes = vocab * d_model * itemsize

    # Resident one-hot-MXU path only when the word table fits comfortably in a
    # single core's VMEM (each TensorCore duplicates it under megacore sharding)
    # and the one-hot intermediate stays reasonable.
    use_resident = (table_bytes <= budget // 2) and (vocab <= 4096)
    if force_path == "hbm":
        use_resident = False
    elif force_path == "resident":
        use_resident = True

    # Tile size along seq: target >= ~2 MiB output tiles, multiple of 8 sublanes,
    # bounded by seq and by the per-core VMEM budget.
    if seq_tile is None:
        ts = _round_up(max(256, (2 * 1024 * 1024) // max(1, d_model * itemsize)), 8)
    else:
        ts = _round_up(int(seq_tile), 8)
    ts = min(ts, _round_up(seq, 8))
    while ts > 8:
        per_step = 4 * ts * d_model * itemsize     # pos + out, double buffered
        per_step += 2 * ts * 128 * 4               # ids block ((ts,1) pads lanes)
        per_step += ts * d_model * 4               # f32 accumulator tile
        if use_resident:
            per_step += ts * vocab * 4             # one-hot intermediate
            fixed = table_bytes
        else:
            per_step += ts * d_model * itemsize    # DMA staging tile
            fixed = 0
        if fixed + per_step <= budget:
            break
        ts //= 2
    ts = max(8, (ts // 8) * 8)

    num_s_blocks = pl.cdiv(seq, ts)
    grid = (num_s_blocks, batch)                   # batch innermost: pos block reused

    vmem_needed = ((table_bytes if use_resident else 0)
                   + 6 * ts * d_model * itemsize
                   + (ts * vocab * 4 if use_resident else ts * d_model * itemsize)
                   + 2 * ts * 128 * 4)
    vmem_limit = min(int(0.9 * cap), int(vmem_needed) + (8 << 20))
    vmem_limit = max(vmem_limit, 16 * 1024 * 1024)

    out_shape = jax.ShapeDtypeStruct((batch, seq, d_model), word_weight.dtype)
    compiler_params = pltpu.CompilerParams(
        dimension_semantics=("parallel", "parallel"),
        vmem_limit_bytes=vmem_limit,
    )

    if use_resident:
        ids3 = ids.astype(jnp.int32).reshape(batch, seq, 1)
        return pl.pallas_call(
            _resident_kernel,
            out_shape=out_shape,
            grid=grid,
            in_specs=[
                pl.BlockSpec((1, ts, 1), lambda s, b: (b, s, 0)),    # token ids (per tile)
                pl.BlockSpec(memory_space=pltpu.MemorySpace.VMEM),   # word table (resident)
                pl.BlockSpec((ts, d_model), lambda s, b: (s, 0)),    # positional rows
            ],
            out_specs=pl.BlockSpec((1, ts, d_model), lambda s, b: (b, s, 0)),
            compiler_params=compiler_params,
            cost_estimate=pl.CostEstimate(
                flops=2 * n_rows * vocab * d_model + n_rows * d_model,
                transcendentals=0,
                bytes_accessed=int(n_rows * d_model * itemsize   # output (write only)
                                   + n_rows * 4                  # ids
                                   + table_bytes                 # word table, read once
                                   + seq * d_model * itemsize),  # pos rows, read once
            ),
        )(ids3, word_weight, pos_weight)

    # Large-vocab path: ids must be SMEM-readable to drive the per-row DMAs, so
    # they are scalar-prefetched (bounds batch*seq by SMEM only on this path).
    window = int(min(8, ts))
    ids_flat = ids.astype(jnp.int32).reshape(-1)
    kernel = functools.partial(_hbm_gather_kernel, seq=seq)
    return pl.pallas_call(
        kernel,
        out_shape=out_shape,
        grid_spec=pltpu.PrefetchScalarGridSpec(
            num_scalar_prefetch=1,
            grid=grid,
            in_specs=[
                pl.BlockSpec(memory_space=pl.ANY),                      # word table in HBM
                pl.BlockSpec((ts, d_model), lambda s, b, ids: (s, 0)),  # positional rows
            ],
            out_specs=pl.BlockSpec((1, ts, d_model), lambda s, b, ids: (b, s, 0)),
            scratch_shapes=[
                pltpu.VMEM((ts, d_model), word_weight.dtype),           # gather staging
                pltpu.SemaphoreType.DMA((window,)),                     # in-flight window
            ],
        ),
        compiler_params=compiler_params,
        cost_estimate=pl.CostEstimate(
            flops=n_rows * d_model,
            transcendentals=0,
            bytes_accessed=int(2 * n_rows * d_model * itemsize          # gathered rows + out
                               + n_rows * 4
                               + seq * d_model * itemsize),
        ),
    )(ids_flat, word_weight, pos_weight)


if __name__ == "__main__":
    # Small shapes consistent with the module.
    batch, seq = 2, 8
    d_model = 32
    num_tokens = 16
    max_len = 16  # >= seq

    key = jax.random.PRNGKey(0)
    k_ids, k_word, k_pos = jax.random.split(key, 3)

    # Deterministic parameter init matching nn.init.normal_(std=0.02).
    word_weight = 0.02 * jax.random.normal(k_word, (num_tokens, d_model), jnp.float32)
    pos_weight = 0.02 * jax.random.normal(k_pos, (max_len, d_model), jnp.float32)
    ids = jax.random.randint(k_ids, (batch, seq), 0, num_tokens, dtype=jnp.int32)

    out = full_embedding(ids, word_weight, pos_weight)
    out = jax.block_until_ready(out)

    # Reference (plain JAX) check of the PyTorch semantics.
    ref = word_weight[ids] + pos_weight[jnp.arange(seq)][None, :, :]
    assert out.shape == (batch, seq, d_model)
    assert jnp.allclose(out, ref, atol=1e-5, rtol=1e-5), "mismatch vs reference"

    # NOTE: dropout(p=0.0) is identity; separate_encodings=False path implemented.
    print("KERNEL_OK")
</pallas_src>

<mosaic_0001>
module attributes {stable_mosaic.version = 11 : i64} {
  func.func @_resident_kernel(%arg0: i32, %arg1: i32, %arg2: memref<1x8x1xi32, #tpu.memory_space<vmem>>, %arg3: memref<16x32xf32, #tpu.memory_space<vmem>>, %arg4: memref<8x32xf32, #tpu.memory_space<vmem>>, %arg5: memref<1x8x32xf32, #tpu.memory_space<vmem>>) attributes {dimension_semantics = [#tpu.dimension_semantics<parallel>, #tpu.dimension_semantics<parallel>], iteration_bounds = array<i64: 1, 2>, scalar_prefetch = 0 : i64, scratch_operands = 0 : i64, tpu.core_type = #tpu.core_type<tc>, window_params = [{transform_indices = @transform_0, window_bounds = array<i64: 1, 8, 1>}, {pipeline_mode = #tpu.pipeline_mode<synchronous>, transform_indices = @transform_1, window_bounds = array<i64: 16, 32>}, {transform_indices = @transform_2, window_bounds = array<i64: 8, 32>}, {transform_indices = @transform_3, window_bounds = array<i64: 1, 8, 32>}]} {
    %c0 = arith.constant 0 : index
    %c0_0 = arith.constant 0 : index
    %c0_1 = arith.constant 0 : index
    %0 = vector.load %arg2[%c0, %c0_0, %c0_1] : memref<1x8x1xi32, #tpu.memory_space<vmem>>, vector<1x8x1xi32>
    %1 = vector.shape_cast %0 : vector<1x8x1xi32> to vector<8x1xi32>
    %2 = tpu.iota {dimensions = array<i32: 1>} : vector<8x16xi32>
    %3 = vector.broadcast %1 : vector<8x1xi32> to vector<8x16xi32>
    %4 = arith.cmpi eq, %3, %2 : vector<8x16xi32>
    %5 = arith.extui %4 : vector<8x16xi1> to vector<8x16xi32>
    %6 = arith.sitofp %5 : vector<8x16xi32> to vector<8x16xf32>
    %c0_2 = arith.constant 0 : index
    %c0_3 = arith.constant 0 : index
    %7 = vector.load %arg3[%c0_2, %c0_3] : memref<16x32xf32, #tpu.memory_space<vmem>>, vector<16x32xf32>
    %cst = arith.constant dense<0.000000e+00> : vector<8x32xf32>
    %8 = tpu.matmul %6, %7, %cst {dimension_numbers = #tpu.dot_dimension_numbers<[1], [0], [0], [1], [0, 0, 1, 1], [], []>, precision = #tpu.contract_precision<fp32>} : vector<8x16xf32>, vector<16x32xf32>, vector<8x32xf32> -> vector<8x32xf32>
    %c0_4 = arith.constant 0 : index
    %c0_5 = arith.constant 0 : index
    %9 = vector.load %arg4[%c0_4, %c0_5] : memref<8x32xf32, #tpu.memory_space<vmem>>, vector<8x32xf32>
    %10 = arith.addf %8, %9 : vector<8x32xf32>
    %c0_6 = arith.constant 0 : index
    %c0_7 = arith.constant 0 : index
    %c0_8 = arith.constant 0 : index
    %11 = vector.load %arg5[%c0_6, %c0_7, %c0_8] : memref<1x8x32xf32, #tpu.memory_space<vmem>>, vector<1x8x32xf32>
    %12 = vector.shape_cast %11 : vector<1x8x32xf32> to vector<8x32xf32>
    %13 = vector.shape_cast %10 : vector<8x32xf32> to vector<1x8x32xf32>
    tpu.vector_store %arg5[%c0_6, %c0_7, %c0_8], %13 {strides = array<i32>} : memref<1x8x32xf32, #tpu.memory_space<vmem>>, vector<1x8x32xf32>,
    return
  }
  func.func @transform_0(%arg0: i32, %arg1: i32) -> (i32, i32, i32) {
    %c0_i32 = arith.constant 0 : i32
    %c0_i32_0 = arith.constant 0 : i32
    return %arg1, %arg0, %c0_i32 : i32, i32, i32
  }
  func.func @transform_1(%arg0: i32, %arg1: i32) -> (i32, i32) {
    %c0_i32 = arith.constant 0 : i32
    %c0_i32_0 = arith.constant 0 : i32
    %c0_i32_1 = arith.constant 0 : i32
    return %c0_i32, %c0_i32_0 : i32, i32
  }
  func.func @transform_2(%arg0: i32, %arg1: i32) -> (i32, i32) {
    %c0_i32 = arith.constant 0 : i32
    %c0_i32_0 = arith.constant 0 : i32
    return %arg0, %c0_i32 : i32, i32
  }
  func.func @transform_3(%arg0: i32, %arg1: i32) -> (i32, i32, i32) {
    %c0_i32 = arith.constant 0 : i32
    %c0_i32_0 = arith.constant 0 : i32
    return %arg1, %arg0, %c0_i32 : i32, i32, i32
  }
}

</mosaic_0001>

<bundles_post_ra>
// kernel: tpu_custom_call.1
= control target key start
LH: loop header
LB: loop body
LE: loop exit
PB: predicated region body
PF: predicated region fallthrough
CT: control target
= control target key end

     0   :  { %8 = vsyncpa [#allocation3], 0  ;;  %s1204_s0 = inlined_call_operand.vmem [shape: s32[2,8,1], index: 0, kind: input, shape index: {}]   ;;  %s1205_s1 = inlined_call_operand.vmem [shape: f32[16,32], index: 1, kind: input, shape index: {}]   ;;  %s1206_s2 = inlined_call_operand.hbm [shape: f32[16,32], index: 2, kind: input, shape index: {}]   ;;  %s1207_s3 = inlined_call_operand.hbm [shape: f32[2,8,32], index: 3, kind: output, shape index: {}]  }
   0x1   :  { %9 = vsyncpa [#allocation4], 0 }
   0x2   :  { %11 = vsyncpa [#allocation4 + $0x1], 0  ;;  %s1068_s12 = smov 0   ;;  %s1070_s13 = smov 0  }
   0x3   :  { %s1072_s14 = smov 0   ;;  %s1074_s15 = smov 0  }
   0x4   :  { %s1076_s16 = smov 0   ;;  %s1078_s17 = smov 0  }
   0x5 LB: > { %s788_s18 = sadd.s32 4294967295, %s1041_s17   ;;  %s789_s19 = sadd.s32 4294967294, %s1041_s17   ;;  %s1041_s17 = sphi %s1078_s17, %s17_s17   ;;  %s1037_s16 = sphi %s1076_s16, %s1216_s16   ;;  %s1033_s15 = sphi %s1074_s15, %s1215_s15   ;;  %s1029_s14 = sphi %s1072_s14, %s1214_s14   ;;  %s1025_s13 = sphi %s1070_s13, %s1213_s13   ;;  %s1021_s12 = sphi %s1068_s12, %s1212_s12  }
   0x6   : > { %s26_s20 = sadd.s32 1, %s1037_s16  ;;  %s113_s21 = sadd.s32 1, %s1029_s14 }
   0x7   : > { %p27_p0 = scmp.ge.s32.totalorder %s26_s20, 2  ;;  %p123_p1 = scmp.ne.s32.totalorder %s1029_s14, %s1025_s13 }
   0x8   : > { %p124_p2 = scmp.eq.s32.totalorder %s788_s18, 1  ;;  %p129_p3 = scmp.ne.s32.totalorder %s1025_s13, %s1021_s12 }
   0x9   : > { %s1218_s20 = smov (%p27_p0, %s26_s20), 0  ;;  %p130_p5 = scmp.eq.s32.totalorder %s789_s19, 1 }
   0xa   : > { %p1108_p4 = por %p124_p2, %p123_p1  ;;  %s108_s23 = ssub.s32 %s1037_s16, %s1218_s20 }
   0xb   : > { %p790_p6 = scmp.ge.s32.totalorder %s1041_s17, 1  ;;  %p111_p7 = scmp.eq.s32.totalorder %s108_s23, 0 }
   0xc   : > { %p1115_p8 = por %p130_p5, %p129_p3  ;;  %p137_p9 = scmp.lt.s32.totalorder %s1041_s17, 3 }
   0xd   : > { %s1121_s25 = scalar_select %p111_p7, %s1029_s14, %s113_s21  }
   0xe   : > { %p1123_p10 = pnand %p790_p6, %p137_p9  ;;  %p1127_p11 = scmp.eq.s32.totalorder %s788_s18, 0 }
   0xf   : > { %s1043_s28 = smov [#allocation2]  }
  0x10   : > { %p871_p12 = pneg %p1123_p10  ;;  %s155_s29 = sshll.u32 %s1043_s28, 4  ;;  %s156_s29 = int_to_ptr.vmem [resolvable:$true] %s155_s29 }
  0x11   : > { %s946_s30 = scalar_lea.vmem %s156_s29, 128  ;;  %p954_p5 = scmp.lt.s32.totalorder %s156_s29, %s156_s29 }
  0x12   : > { %p872_p13 = pnand %p1127_p11, %p871_p12  ;;  %p947_p1 = scmp.ne.s32.totalorder %s156_s29, %s946_s30 }
  0x13   : > { %p955_p6 = scmp.lt.s32.totalorder %s946_s30, %s946_s30 }
  0x14   : > { %p937_p0 = pneg %p872_p13 }
  0x15   : > { %p956_p7 = por %p955_p6, %p954_p5 }
  0x16   : > { %p949_p2 = pnand %p947_p1, %p937_p0 }
  0x18   : > { %p950_p3 = pneg %p949_p2 }
  0x1a   : > { %p957_p9 = pnand %p956_p7, %p950_p3 }
  0x1c   : > { %960 = shalt.err (!%p957_p9)
}
  0x1d   : > { %874 = dma.hbm_to_vmem [thread:$0]  (!%p872_p13), %s1206_s2, 128, %s156_s29, [#allocation3]  }
  0x1e   : > { %178 = sbr.rel (%p1123_p10) target bundleno = 396 (0x18c), region = 32 }
  0x23   : > { %1012 = dma.done.wait (%p1127_p11), [#allocation3], 128  }
  0x24   : > { %1014 = vsyncadd (%p1127_p11), [#allocation3], 4294967168  ;;  %p204_p12 = scmp.lt.s32.totalorder %s1033_s15, 1  ;;  %v1044_v0 = vmov 0   ;;  %v1045_v1 = vmov 0.0   ;;  %vm1046_vm0 = vmmov 0   ;;  %v212_v15 = vlaneseq }
  0x25   : > { %934 = vset.pattern.permute.xlu0 %v1044_v0  ;;  %830 = vmatprep.subr.mxu1 %v1045_v1  ;;  %v221_v3 = vld [vmem:[%s1205_s1 + $0x8] sm:$0xff]  ;;  %v220_v4 = vld [vmem:[%s1205_s1] sm:$0xff]  ;;  %vm223_vm1 = vcmask 130048   ;;  %s201_s23 = sand.u32 1, %s1025_s13   ;;  %s802_s27 = sshll.u32 %s1033_s15, 7  ;;  %vm686_vm3 = vcmask 261120  }
  0x26   : > { %s205_s6 = scalar_select %p204_p12, %s1033_s15, 1  ;;  %823 = vmatprep.subr.mxu0 %v1045_v1  ;;  %834 = vmatprep.mubr.msk.f32.mxu1 %vm1046_vm0, %v1045_v1  ;;  %v256_v5 = vand.u32 4294901760, %v221_v3  ;;  %v259_v6 = vand.u32 4294901760, %v220_v4  ;;  %v213_v16 = vand.u32 127, %v212_v15  ;;  %v222_v28 = vld [vmem:[#allocation2] sm:$0xff] }
  0x27   : > { %827 = vmatprep.mubr.msk.f32.mxu0 %vm1046_vm0, %v1045_v1  ;;  %s795_s26 = sshll.u32 %s201_s23, 3  ;;  %s701_s5 = scalar_lea.hbm %s1207_s3, %s802_s27 }
  0x28   : > { %s796_s7 = sshll.u32 %s205_s6, 3  ;;  %v334_v7 = vsub.f32 %v221_v3, %v256_v5  ;;  %v341_v8 = vsub.f32 %v220_v4, %v259_v6  ;;  %824 = vmatpush3.msra.mxu0 %v256_v5  ;;  %s203_s28 = scalar_lea.vmem [#allocation5], %s795_s26 }
  0x29   : > { %s210_s10 = scalar_lea.vmem %s1204_s0, %s796_s7  ;;  %825 = vmatprep.subr.mxu0 %v1045_v1  ;;  %s703_s29 = sshll.u32 %s203_s28, 4  ;;  %s704_s29 = int_to_ptr.vmem [resolvable:$true] %s703_s29 }
  0x2a   : > { %v211_v2 = vld [vmem:[%s210_s10] sm:$0xff]  ;;  %v335_v9 = vand.u32 4294901760, %v334_v7  ;;  %v342_v10 = vand.u32 4294901760, %v341_v8  ;;  %826 = vmatpush3.msra.mxu0 %v259_v6  ;;  %s689_s6 = scalar_lea.sflag [#allocation4], %s201_s23  ;;  %s961_s7 = scalar_lea.vmem %s704_s29, 128 }
  0x2b   : > { %215 = vperm.xlu0 %934, %v211_v2   ;;  %837 = vmatprep.subr.mxu0 %v1045_v1  ;;  %p962_p10 = scmp.ne.s32.totalorder %s704_s29, %s961_s7  ;;  %s1047_s8 = smov [#allocation5]  }
  0x2c   : > { %v336_v11 = vsub.f32 %v334_v7, %v335_v9  ;;  %v343_v12 = vsub.f32 %v341_v8, %v342_v10  ;;  %s965_s15 = sshll.u32 %s1047_s8, 4  ;;  %s966_s15 = int_to_ptr.vmem [resolvable:$false] %s965_s15 }
  0x2d   : > { %p963_p11 = pnand %p962_p10, %p1108_p4  ;;  %s967_s9 = scalar_lea.vmem %s966_s15, 256 }
  0x2e   : > { %v337_v13 = vand.u32 4294901760, %v336_v11  ;;  %v344_v14 = vand.u32 4294901760, %v343_v12  ;;  %p968_p0 = scmp.lt.s32.totalorder %s704_s29, %s966_s15  ;;  %p969_p1 = scmp.lt.s32.totalorder %s967_s9, %s961_s7 }
  0x2f   : > { %p964_p13 = pneg %p963_p11 }
  0x30   : > { %831 = vmatpush3.msra.mxu1 %v337_v13  ;;  %p970_p2 = por %p969_p1, %p968_p0 }
  0x31   : > { %832 = vmatprep.subr.mxu1 %v1045_v1 }
  0x32   : > { %833 = vmatpush3.msra.mxu1 %v344_v14  ;;  %p971_p3 = pnand %p970_p2, %p964_p13 }
  0x33   : > { %844 = vmatprep.subr.mxu1 %v1045_v1 }
  0xa6   : > { %v216_v17 = vpop.permute.xlu0 %215 }
  0xa7   : > { %vm217_vm2 = vcmp.eq.s32.totalorder %v216_v17, %v213_v16 }
  0xa8   : > { %v797_v18 = vsel %vm217_vm2, 1.0, %v1045_v1 }
  0xa9   : > { %v225_v19 = vsel %vm223_vm1, %v797_v18, 0  ;;  %835 = vmatmul.mubr.msk.f32.vlgmr.msra.gmra.mxu1 %vm223_vm1, %v797_v18 }
  0xaa   : > { %v295_v20 = vsub.f32 %v225_v19, %v225_v19  ;;  %845 = vmatpush3.msra.mxu1 %v256_v5  ;;  %848 = vmatprep.mubr.msk.f32.mxu1 %vm1046_vm0, %v1045_v1 }
  0xab   : > { %846 = vmatprep.subr.mxu1 %v1045_v1 }
  0xac   : > { %847 = vmatpush3.msra.mxu1 %v259_v6  ;;  %v296_v21 = vand.u32 4294901760, %v295_v20 }
  0xad   : > { %858 = vmatprep.subr.mxu1 %v1045_v1 }
  0xae   : > { %849 = vmatmul.mubr.f32.vlgmr.msra.gmra.mxu1 %v296_v21  ;;  %v297_v22 = vsub.f32 %v295_v20, %v296_v21 }
  0xaf   : > { %859 = vmatpush3.msra.mxu1 %v256_v5  ;;  %862 = vmatprep.mubr.msk.f32.mxu1 %vm1046_vm0, %v1045_v1 }
  0xb0   : > { %860 = vmatprep.subr.mxu1 %v1045_v1  ;;  %v298_v23 = vand.u32 4294901760, %v297_v22 }
  0xb1   : > { %861 = vmatpush3.msra.mxu1 %v259_v6 }
  0xb2   : > { %828 = vmatmul.mubr.f32.vlgmr.msra.gmra.mxu0 %v298_v23  ;;  %863 = vmatmul.mubr.msk.f32.vlgmr.msra.gmra.mxu1 %vm223_vm1, %v797_v18 }
  0xb3   : > { %838 = vmatpush3.msra.mxu0 %v334_v7  ;;  %841 = vmatprep.mubr.msk.f32.mxu0 %vm1046_vm0, %v1045_v1 }
  0xb4   : > { %839 = vmatprep.subr.mxu0 %v1045_v1 }
  0xb5   : > { %840 = vmatpush3.msra.mxu0 %v341_v8 }
  0xb6   : > { %851 = vmatprep.subr.mxu0 %v1045_v1  ;;  %842 = vmatmul.mubr.f32.vlgmr.msra.gmra.mxu0 %v295_v20 }
  0xb7   : > { %852 = vmatpush3.msra.mxu0 %v335_v9  ;;  %855 = vmatprep.mubr.msk.f32.mxu0 %vm1046_vm0, %v1045_v1 }
  0xb8   : > { %853 = vmatprep.subr.mxu0 %v1045_v1 }
  0xb9   : > { %854 = vmatpush3.msra.mxu0 %v342_v10 }
  0xba   : > { %856 = vmatmul.mubr.msk.f32.vlgmr.msra.gmra.mxu0 %vm223_vm1, %v797_v18 }
 0x169   : > { %v381_v24 = vpop.f32.mrf.mxu1 }
 0x16b   : > { %v836_v25 = vpop.f32.mrf.mxu1 }
 0x16e   : > { %v532_v26 = vpop.f32.mrf.mxu1 }
 0x170   : > { %v850_v27 = vpop.f32.mrf.mxu1 }
 0x172   : > { %v300_v29 = vpop.f32.mrf.mxu0  ;;  %v682_v30 = vpop.f32.mrf.mxu1 }
 0x173   : > { %v301_v31 = vadd.f32 %v300_v29, %v222_v28 }
 0x174   : > { %v829_v32 = vpop.f32.mrf.mxu0  ;;  %v864_v33 = vpop.f32.mrf.mxu1 }
 0x175   : > { %v382_v34 = vadd.f32 %v381_v24, %v301_v31 }
 0x176   : > { %v457_v35 = vpop.f32.mrf.mxu0 }
 0x177   : > { %v458_v36 = vadd.f32 %v457_v35, %v382_v34 }
 0x178   : > { %v843_v37 = vpop.f32.mrf.mxu0 }
 0x179   : > { %v533_v38 = vadd.f32 %v532_v26, %v458_v36 }
 0x17a   : > { %v609_v39 = vpop.f32.mrf.mxu0 }
 0x17b   : > { %v610_v40 = vadd.f32 %v609_v39, %v533_v38 }
 0x17c   : > { %v857_v41 = vpop.f32.mrf.mxu0 }
 0x17d   : > { %v683_v42 = vadd.f32 %v682_v30, %v610_v40 }
 0x17f   : > { %687 = vst.msk [vmem:[%s203_s28] sm:$0xff] %vm686_vm3, %v683_v42 }
 0x180   : > { %974 = shalt.err (!%p971_p3)
}
 0x181   : > { %s975_s10 = scalar_lea.hbm %s701_s5, 128  ;;  %s979_s19 = scalar_lea.hbm %s1207_s3, 256 }
 0x182   : > { %p976_p5 = scmp.ne.s32.totalorder %s701_s5, %s975_s10  ;;  %p980_p9 = scmp.lt.s32.totalorder %s701_s5, %s1207_s3 }
 0x183   : > { %p981_p12 = scmp.lt.s32.totalorder %s979_s19, %s975_s10 }
 0x184   : > { %p977_p6 = pnand %p976_p5, %p1108_p4 }
 0x185   : > { %p982_p10 = por %p981_p12, %p980_p9 }
 0x186   : > { %p978_p7 = pneg %p977_p6 }
 0x188   : > { %p983_p11 = pnand %p982_p10, %p978_p7 }
 0x18a   : > { %986 = shalt.err (!%p983_p11)
}
 0x18b   : > { %869 = dma.vmem_to_hbm [thread:$0]  (%p1108_p4), %s704_s29, 128, %s701_s5, %s689_s6  }
 0x18c PF: > { %p881_p13 = scmp.ge.s32.totalorder %s1041_s17, 2  ;;  %s715_s26 = sand.u32 1, %s1021_s12  }
 0x18d   : > { %s716_s27 = scalar_lea.sflag [#allocation4], %s715_s26 }
 0x18e   : > { %p876_p0 = pnand %p881_p13, %p1115_p8 }
 0x190   : > { %p877_p1 = pneg %p876_p0 }
 0x192   : > { %1016 = dma.done.wait (%p877_p1), %s716_s27, 128  }
 0x193   : > { %1018 = vsyncadd (%p877_p1), %s716_s27, 4294967168  ;;  %s17_s17 = sadd.s32 1, %s1041_s17   ;;  %s1212_s12 = smov %s1025_s13 }
 0x194   : > { %p14_p2 = scmp.ge.s32.totalorder %s17_s17, 4   ;;  %s1213_s13 = smov %s1029_s14 }
 0x195   : > { %s1214_s14 = smov %s1121_s25  ;;  %s1215_s15 = smov %s1037_s16 }
 0x196   : > { %s1216_s16 = smov %s1218_s20  ;;  %16 = sbr.rel (!%p14_p2) target bundleno = 5 (0x5), region = 73 }
 0x19b   :  { %721 = vsyncpa [#allocation3], 1 }
 0x19c   :  { %723 = vsyncpa [#allocation3 + $0x1], 1 }
 0x19d   :  { %724 = vsyncpa [#allocation4], 1 }
 0x19e   :  { %726 = vsyncpa [#allocation4 + $0x1], 1 }

</bundles_post_ra>
